<compile_context>
chip_gen: v6e
topology: v6e:2x2x1
jax: 0.10.0
libtpu: 0.0.40
codegen_flags: <defaults>
</compile_context>

<pallas_src>
import functools

import jax
import jax.numpy as jnp
from jax.experimental import pallas as pl
from jax.experimental.pallas import tpu as pltpu


# ---------------------------------------------------------------------------
# Hardware-aware budgets
# ---------------------------------------------------------------------------
def _vmem_limit_bytes():
    """Scoped-VMEM limit: 32 MiB, but never more than half physical VMEM
    (128 MiB on v5e/v6e, 64 MiB on v7x)."""
    phys = 128 << 20
    try:
        info = pltpu.get_tpu_info()
        phys = int(getattr(info, "vmem_capacity_bytes", phys) or phys)
    except Exception:
        pass
    return min(32 << 20, phys // 2)


def _use_fused_slab(c, s, itemsize, vmem_limit):
    # 2x double-buffered input + 2x output slabs + one f32 elementwise temp.
    working = c * s * (4 * itemsize + 4)
    return working <= int(0.75 * vmem_limit)


def _pick_spatial_tile(s, c, itemsize, vmem_limit, tile_bytes_target):
    """Byte-targeted lane-dense spatial tile (multiple of 128), capped so the
    pass-2 working set (2x in + 2x out buffers + f32 temp) fits scoped VMEM."""
    if s <= 128:
        return s
    ts = (tile_bytes_target // (c * itemsize)) // 128 * 128
    per_lane = c * (4 * itemsize + 4)
    cap = (int(0.7 * vmem_limit) // per_lane) // 128 * 128
    ts = max(128, min(ts, cap))
    return s if ts >= s else ts


# ---------------------------------------------------------------------------
# Fused single-pass kernel: pool + gate + scale on a whole (1, C, S) slab.
# ---------------------------------------------------------------------------
def _fused_kernel(x_ref, w1_ref, w2_ref, o_ref, *, inv_s):
    x = x_ref[...]                                                   # (1, C, S)
    xf = x if x.dtype == jnp.float32 else x.astype(jnp.float32)
    pooled = jnp.sum(xf, axis=-1) * inv_s                            # (1, C) f32
    h = jnp.dot(pooled, w1_ref[...], preferred_element_type=jnp.float32)
    h = h * jax.nn.sigmoid(h)                                        # Swish
    g = jax.nn.sigmoid(
        jnp.dot(h, w2_ref[...], preferred_element_type=jnp.float32))  # (1, C) f32
    o_ref[...] = (x * g[:, :, None]).astype(o_ref.dtype)


# ---------------------------------------------------------------------------
# Tiled pass 1: spatially tiled f32 pooling, gate FC fused into the last step.
# ---------------------------------------------------------------------------
def _pool_gate_kernel(x_ref, w1_ref, w2_ref, gate_ref, *,
                      s_total, ts, inv_s, need_mask):
    # x_ref: (1, C, TS); gate_ref: (1, C, 1) f32, resident over the S axis.
    s_idx = pl.program_id(1)
    last = pl.num_programs(1) - 1

    @pl.when(s_idx == 0)
    def _init():
        gate_ref[...] = jnp.zeros_like(gate_ref)

    def _accum(x):
        xf = x if x.dtype == jnp.float32 else x.astype(jnp.float32)
        gate_ref[...] += jnp.sum(xf, axis=-1, keepdims=True)

    if need_mask:
        # Mask only the tail tile; hot-loop tiles accumulate unmasked.
        @pl.when(s_idx < last)
        def _full():
            _accum(x_ref[...])

        @pl.when(s_idx == last)
        def _tail():
            x = x_ref[...]
            lane = jax.lax.broadcasted_iota(jnp.int32, x.shape, 2)
            _accum(jnp.where(lane < (s_total - s_idx * ts), x,
                             jnp.zeros_like(x)))
    else:
        _accum(x_ref[...])

    @pl.when(s_idx == last)
    def _finalize():
        pooled = gate_ref[...][:, :, 0] * inv_s                      # (1, C) f32
        h = jnp.dot(pooled, w1_ref[...], preferred_element_type=jnp.float32)
        h = h * jax.nn.sigmoid(h)                                    # Swish
        g = jax.nn.sigmoid(
            jnp.dot(h, w2_ref[...], preferred_element_type=jnp.float32))
        gate_ref[...] = g[:, :, None]                                # (1, C, 1)


# ---------------------------------------------------------------------------
# Tiled pass 2: rescale x by the per-(batch, channel) f32 gate.
# ---------------------------------------------------------------------------
def _scale_kernel(x_ref, gate_ref, o_ref):
    # x_ref/o_ref: (1, C, TS); gate_ref: (1, C, 1) f32 (reference precision).
    o_ref[...] = (x_ref[...] * gate_ref[...]).astype(o_ref.dtype)


# ---------------------------------------------------------------------------
# Wrapper
# ---------------------------------------------------------------------------
def se_layer(x, w1, w2, *, force_tiled=False, tile_bytes=2 << 20):
    """x: (B, C, D, H, W); w1 = fc[0].weight.T (C, C//r); w2 = fc[2].weight.T (C//r, C)."""
    B, C, D, H, W = x.shape
    S = D * H * W
    x_flat = x.reshape(B, C, S)
    inv_s = 1.0 / float(S)
    itemsize = x.dtype.itemsize
    vmem_limit = _vmem_limit_bytes()

    # --- Fused single-pass path: one HBM read + one write, one launch. ------
    if not force_tiled and _use_fused_slab(C, S, itemsize, vmem_limit):
        out_flat = pl.pallas_call(
            functools.partial(_fused_kernel, inv_s=inv_s),
            out_shape=jax.ShapeDtypeStruct((B, C, S), x.dtype),
            grid_spec=pltpu.PrefetchScalarGridSpec(
                num_scalar_prefetch=0,
                grid=(B,),
                in_specs=[
                    pl.BlockSpec((1, C, S), lambda b: (b, 0, 0)),
                    pl.BlockSpec(w1.shape, lambda b: (0, 0)),
                    pl.BlockSpec(w2.shape, lambda b: (0, 0)),
                ],
                out_specs=pl.BlockSpec((1, C, S), lambda b: (b, 0, 0)),
            ),
            compiler_params=pltpu.CompilerParams(
                dimension_semantics=("parallel",),
                vmem_limit_bytes=vmem_limit),
        )(x_flat, w1, w2)
        return out_flat.reshape(B, C, D, H, W)

    # --- Tiled two-pass path -------------------------------------------------
    ts = _pick_spatial_tile(S, C, itemsize, vmem_limit, tile_bytes)
    n_s = pl.cdiv(S, ts)
    need_mask = (S % ts) != 0

    # Pass 1: tiled pooling with the gate FC stack fused into the last S step.
    gate = pl.pallas_call(
        functools.partial(_pool_gate_kernel, s_total=S, ts=ts,
                          inv_s=inv_s, need_mask=need_mask),
        out_shape=jax.ShapeDtypeStruct((B, C, 1), jnp.float32),
        grid_spec=pltpu.PrefetchScalarGridSpec(
            num_scalar_prefetch=0,
            grid=(B, n_s),
            in_specs=[
                pl.BlockSpec((1, C, ts), lambda b, s: (b, 0, s)),
                pl.BlockSpec(w1.shape, lambda b, s: (0, 0)),
                pl.BlockSpec(w2.shape, lambda b, s: (0, 0)),
            ],
            out_specs=pl.BlockSpec((1, C, 1), lambda b, s: (b, 0, 0)),
        ),
        compiler_params=pltpu.CompilerParams(
            dimension_semantics=("parallel", "arbitrary"),
            vmem_limit_bytes=vmem_limit),
    )(x_flat, w1, w2)

    # Pass 2: rescale, lane-dense tiles, f32 gate, native output dtype.
    out_flat = pl.pallas_call(
        _scale_kernel,
        out_shape=jax.ShapeDtypeStruct((B, C, S), x.dtype),
        grid_spec=pltpu.PrefetchScalarGridSpec(
            num_scalar_prefetch=0,
            grid=(B, n_s),
            in_specs=[
                pl.BlockSpec((1, C, ts), lambda b, s: (b, 0, s)),
                pl.BlockSpec((1, C, 1), lambda b, s: (b, 0, 0)),
            ],
            out_specs=pl.BlockSpec((1, C, ts), lambda b, s: (b, 0, s)),
        ),
        compiler_params=pltpu.CompilerParams(
            dimension_semantics=("parallel", "parallel"),
            vmem_limit_bytes=vmem_limit),
    )(x_flat, gate)

    return out_flat.reshape(B, C, D, H, W)


def se_layer_ref(x, w1, w2):
    """Pure-JAX reference mirroring the PyTorch forward."""
    y = jnp.mean(x, axis=(2, 3, 4))                                  # AdaptiveAvgPool3d(1)
    h = y @ w1
    h = h * jax.nn.sigmoid(h)                                        # Swish
    g = jax.nn.sigmoid(h @ w2)                                       # Sigmoid gate
    return (x * g[:, :, None, None, None]).astype(x.dtype)


if __name__ == "__main__":
    key = jax.random.PRNGKey(0)
    k_x1, k_x2, k_w1, k_w2 = jax.random.split(key, 4)

    # Small shapes consistent with the module: channel=32, reduction=16.
    B, C, reduction = 2, 32, 16
    hidden = C // reduction

    w1 = jax.random.normal(k_w1, (C, hidden), dtype=jnp.float32) * 0.1  # Linear(C, C//r).weight.T
    w2 = jax.random.normal(k_w2, (hidden, C), dtype=jnp.float32) * 0.1  # Linear(C//r, C).weight.T

    # Case 1: D*H*W = 256, fused single-pass path.
    x1 = jax.random.normal(k_x1, (B, C, 4, 8, 8), dtype=jnp.float32)
    out1 = jax.block_until_ready(se_layer(x1, w1, w2))
    ref1 = se_layer_ref(x1, w1, w2)
    assert out1.shape == x1.shape
    assert jnp.allclose(out1, ref1, atol=1e-5, rtol=1e-5), "mismatch (fused, aligned S)"

    # Case 2: D*H*W = 320 (ragged), fused single-pass path.
    x2 = jax.random.normal(k_x2, (B, C, 5, 8, 8), dtype=jnp.float32)
    out2 = jax.block_until_ready(se_layer(x2, w1, w2))
    ref2 = se_layer_ref(x2, w1, w2)
    assert out2.shape == x2.shape
    assert jnp.allclose(out2, ref2, atol=1e-5, rtol=1e-5), "mismatch (fused, ragged S)"

    # Case 3: force the tiled two-pass path, aligned S (TS=128, 2 tiles).
    out3 = jax.block_until_ready(se_layer(x1, w1, w2, force_tiled=True, tile_bytes=1))
    assert jnp.allclose(out3, ref1, atol=1e-5, rtol=1e-5), "mismatch (tiled, aligned S)"

    # Case 4: force the tiled two-pass path, ragged S (exercises the masked tail tile).
    out4 = jax.block_until_ready(se_layer(x2, w1, w2, force_tiled=True, tile_bytes=1))
    assert jnp.allclose(out4, ref2, atol=1e-5, rtol=1e-5), "mismatch (tiled, ragged S)"

    print("KERNEL_OK")
</pallas_src>

<mosaic_0001>
module attributes {stable_mosaic.version = 11 : i64} {
  func.func @_fused_kernel(%arg0: i32, %arg1: memref<1x32x256xf32, #tpu.memory_space<vmem>>, %arg2: memref<32x2xf32, #tpu.memory_space<vmem>>, %arg3: memref<2x32xf32, #tpu.memory_space<vmem>>, %arg4: memref<1x32x256xf32, #tpu.memory_space<vmem>>) attributes {dimension_semantics = [#tpu.dimension_semantics<parallel>], iteration_bounds = array<i64: 2>, scalar_prefetch = 0 : i64, scratch_operands = 0 : i64, tpu.core_type = #tpu.core_type<tc>, window_params = [{transform_indices = @transform_0, window_bounds = array<i64: 1, 32, 256>}, {pipeline_mode = #tpu.pipeline_mode<synchronous>, transform_indices = @transform_1, window_bounds = array<i64: 32, 2>}, {pipeline_mode = #tpu.pipeline_mode<synchronous>, transform_indices = @transform_2, window_bounds = array<i64: 2, 32>}, {transform_indices = @transform_3, window_bounds = array<i64: 1, 32, 256>}]} {
    %c0 = arith.constant 0 : index
    %c0_0 = arith.constant 0 : index
    %c0_1 = arith.constant 0 : index
    %0 = vector.load %arg1[%c0, %c0_0, %c0_1] : memref<1x32x256xf32, #tpu.memory_space<vmem>>, vector<1x32x256xf32>
    %cst = arith.constant dense<0.000000e+00> : vector<1x32xf32>
    %1 = vector.multi_reduction <add>, %0, %cst [2] : vector<1x32x256xf32> to vector<1x32xf32>
    %cst_2 = arith.constant 3.906250e-03 : f32
    %2 = vector.broadcast %cst_2 : f32 to vector<1x32xf32>
    %3 = arith.mulf %1, %2 : vector<1x32xf32>
    %c0_3 = arith.constant 0 : index
    %c0_4 = arith.constant 0 : index
    %4 = vector.load %arg2[%c0_3, %c0_4] : memref<32x2xf32, #tpu.memory_space<vmem>>, vector<32x2xf32>
    %cst_5 = arith.constant dense<0.000000e+00> : vector<1x2xf32>
    %5 = tpu.matmul %3, %4, %cst_5 {dimension_numbers = #tpu.dot_dimension_numbers<[1], [0], [0], [1], [0, 0, 1, 1], [], []>} : vector<1x32xf32>, vector<32x2xf32>, vector<1x2xf32> -> vector<1x2xf32>
    %6 = arith.negf %5 : vector<1x2xf32>
    %7 = math.exp %6 : vector<1x2xf32>
    %cst_6 = arith.constant 1.000000e+00 : f32
    %8 = vector.broadcast %cst_6 : f32 to vector<1x2xf32>
    %9 = arith.addf %8, %7 : vector<1x2xf32>
    %10 = arith.divf %8, %9 : vector<1x2xf32>
    %11 = arith.mulf %5, %10 : vector<1x2xf32>
    %c0_7 = arith.constant 0 : index
    %c0_8 = arith.constant 0 : index
    %12 = vector.load %arg3[%c0_7, %c0_8] : memref<2x32xf32, #tpu.memory_space<vmem>>, vector<2x32xf32>
    %cst_9 = arith.constant dense<0.000000e+00> : vector<1x32xf32>
    %13 = tpu.matmul %11, %12, %cst_9 {dimension_numbers = #tpu.dot_dimension_numbers<[1], [0], [0], [1], [0, 0, 1, 1], [], []>} : vector<1x2xf32>, vector<2x32xf32>, vector<1x32xf32> -> vector<1x32xf32>
    %14 = arith.negf %13 : vector<1x32xf32>
    %15 = math.exp %14 : vector<1x32xf32>
    %cst_10 = arith.constant 1.000000e+00 : f32
    %16 = vector.broadcast %cst_10 : f32 to vector<1x32xf32>
    %17 = arith.addf %16, %15 : vector<1x32xf32>
    %18 = arith.divf %16, %17 : vector<1x32xf32>
    %19 = vector.shape_cast %18 : vector<1x32xf32> to vector<1x32x1xf32>
    %20 = vector.broadcast %19 : vector<1x32x1xf32> to vector<1x32x256xf32>
    %21 = arith.mulf %0, %20 : vector<1x32x256xf32>
    %c0_11 = arith.constant 0 : index
    %c0_12 = arith.constant 0 : index
    %c0_13 = arith.constant 0 : index
    %22 = vector.load %arg4[%c0_11, %c0_12, %c0_13] : memref<1x32x256xf32, #tpu.memory_space<vmem>>, vector<1x32x256xf32>
    tpu.vector_store %arg4[%c0_11, %c0_12, %c0_13], %21 {strides = array<i32>} : memref<1x32x256xf32, #tpu.memory_space<vmem>>, vector<1x32x256xf32>,
    return
  }
  func.func @transform_0(%arg0: i32) -> (i32, i32, i32) {
    %c0_i32 = arith.constant 0 : i32
    %c0_i32_0 = arith.constant 0 : i32
    %c0_i32_1 = arith.constant 0 : i32
    return %arg0, %c0_i32, %c0_i32_0 : i32, i32, i32
  }
  func.func @transform_1(%arg0: i32) -> (i32, i32) {
    %c0_i32 = arith.constant 0 : i32
    %c0_i32_0 = arith.constant 0 : i32
    %c0_i32_1 = arith.constant 0 : i32
    return %c0_i32, %c0_i32_0 : i32, i32
  }
  func.func @transform_2(%arg0: i32) -> (i32, i32) {
    %c0_i32 = arith.constant 0 : i32
    %c0_i32_0 = arith.constant 0 : i32
    %c0_i32_1 = arith.constant 0 : i32
    return %c0_i32, %c0_i32_0 : i32, i32
  }
  func.func @transform_3(%arg0: i32) -> (i32, i32, i32) {
    %c0_i32 = arith.constant 0 : i32
    %c0_i32_0 = arith.constant 0 : i32
    %c0_i32_1 = arith.constant 0 : i32
    return %arg0, %c0_i32, %c0_i32_0 : i32, i32, i32
  }
}

</mosaic_0001>

<bundles_post_ra>
// kernel: tpu_custom_call.1
= control target key start
LH: loop header
LB: loop body
LE: loop exit
PB: predicated region body
PF: predicated region fallthrough
CT: control target
= control target key end

     0   :  { %8 = vsyncpa [#allocation3], 0  ;;  %s966_s0 = inlined_call_operand.hbm [shape: f32[2,32,256], index: 0, kind: input, shape index: {}]   ;;  %s967_s1 = inlined_call_operand.vmem [shape: f32[32,2], index: 1, kind: input, shape index: {}]   ;;  %s968_s2 = inlined_call_operand.vmem [shape: f32[2,32], index: 2, kind: input, shape index: {}]   ;;  %s969_s3 = inlined_call_operand.hbm [shape: f32[2,32,256], index: 3, kind: output, shape index: {}]  }
   0x1   :  { %10 = vsyncpa [#allocation3 + $0x1], 0 }
   0x2   :  { %11 = vsyncpa [#allocation4], 0 }
   0x3   :  { %13 = vsyncpa [#allocation4 + $0x1], 0  ;;  %s761_s12 = smov 0   ;;  %s763_s13 = smov 0  }
   0x4   :  { %s765_s14 = smov 0   ;;  %s767_s15 = smov 0  }
   0x5 LB: > { %s782_s16 = sadd.s32 4294967295, %s731_s15   ;;  %s535_s17 = sadd.s32 4294967294, %s731_s15   ;;  %s731_s15 = sphi %s767_s15, %s984_s15   ;;  %s727_s14 = sphi %s765_s14, %s983_s14   ;;  %s723_s13 = sphi %s763_s13, %s982_s13   ;;  %s719_s12 = sphi %s761_s12, %s981_s12  }
   0x6   : > { %s786_s18 = sadd.s32 1, %s731_s15   ;;  %s26_s19 = sadd.s32 1, %s727_s14 }
   0x7   : > { %s23_s20 = ssub.s32 %s731_s15, %s786_s18  ;;  %p33_p0 = scmp.ne.s32.totalorder %s727_s14, %s723_s13 }
   0x8   : > { %p24_p1 = scmp.eq.s32.totalorder %s23_s20, 0  ;;  %p34_p2 = scmp.eq.s32.totalorder %s731_s15, 0 }
   0x9   : > { %p39_p3 = scmp.ne.s32.totalorder %s723_s13, %s719_s12  ;;  %p40_p4 = scmp.eq.s32.totalorder %s782_s16, 0 }
   0xa   : > { %s798_s21 = scalar_select %p24_p1, %s727_s14, %s26_s19  }
   0xb   : > { %p800_p5 = por %p34_p2, %p33_p0  ;;  %p804_p6 = por %p40_p4, %p39_p3 }
   0xc   : > { %p105_p7 = scmp.eq.s32.totalorder %s782_s16, 1  ;;  %p111_p8 = scmp.eq.s32.totalorder %s535_s17, 1 }
   0xd   : > { %s973_s23 = scalar_select %p804_p6, 1, 0 }
   0xe   : > { %p591_p10 = scmp.lt.s32.totalorder %s731_s15, 2  ;;  %p811_p11 = por %p105_p7, %p33_p0 }
   0xf   : > { %p815_p12 = por %p111_p8, %p39_p3  ;;  %s137_s26 = sand.u32 1, %s727_s14  }
  0x10   : > { %s974_s24 = scalar_select %p811_p11, 1, 0 }
  0x11   : > { %s975_s25 = scalar_select %p815_p12, 1, 0 }
  0x12   : > { %s554_s27 = sshll.u32 %s731_s15, 10  ;;  %s538_s28 = sshll.u32 %s137_s26, 6 }
  0x13   : > { %s824_s4 = scalar_lea.hbm %s966_s0, %s554_s27  ;;  %s141_s5 = scalar_lea.vmem [#allocation2], %s538_s28 }
  0x14   : > { %s148_s6 = sshll.u32 %s141_s5, 4  ;;  %p828_p13 = pnand %p591_p10, %p800_p5  ;;  %s832_s6 = int_to_ptr.vmem [resolvable:$true] %s148_s6 }
  0x15   : > { %s834_s8 = scalar_lea.sflag [#allocation3], %s137_s26  ;;  %s639_s9 = scalar_lea.hbm %s824_s4, 1024 }
  0x16   : > { %p640_p0 = scmp.ne.s32.totalorder %s824_s4, %s639_s9  ;;  %p641_p1 = pneg %p828_p13 }
  0x17   : > { %s644_s17 = scalar_lea.hbm %s966_s0, 2048  ;;  %p645_p4 = scmp.lt.s32.totalorder %s824_s4, %s966_s0 }
  0x18   : > { %p642_p2 = pnand %p641_p1, %p640_p0  ;;  %p646_p5 = scmp.lt.s32.totalorder %s644_s17, %s639_s9 }
  0x1a   : > { %p643_p3 = pneg %p642_p2  ;;  %p647_p7 = por %p646_p5, %p645_p4 }
  0x1c   : > { %p648_p8 = pnand %p647_p7, %p643_p3 }
  0x1e   : > { %651 = shalt.err (!%p648_p8)
}
  0x1f   : > { %s652_s22 = scalar_lea.vmem %s832_s6, 1024  ;;  %s733_s26 = smov [#allocation2]  }
  0x20   : > { %p653_p10 = scmp.ne.s32.totalorder %s832_s6, %s652_s22  ;;  %s657_s27 = sshll.u32 %s733_s26, 4  ;;  %s658_s27 = int_to_ptr.vmem [resolvable:$false] %s657_s27 }
  0x21   : > { %s659_s28 = scalar_lea.vmem %s658_s27, 2048  ;;  %p660_p2 = scmp.lt.s32.totalorder %s832_s6, %s658_s27 }
  0x22   : > { %p655_p9 = pnand %p653_p10, %p641_p1  ;;  %p661_p12 = scmp.lt.s32.totalorder %s659_s28, %s652_s22 }
  0x24   : > { %p656_p0 = pneg %p655_p9  ;;  %p662_p11 = por %p661_p12, %p660_p2 }
  0x26   : > { %p663_p6 = pnand %p662_p11, %p656_p0 }
  0x28   : > { %666 = shalt.err (!%p663_p6)
}
  0x29   : > { %s734_s29 = smov 256   ;;  %s735_s30 = smov 16  }
  0x2a   : > { %586 = dma.hbm_to_vmem [thread:$0]  (!%p828_p13), %s824_s4, 1024, %s832_s6, %s834_s8, %s734_s29, %s734_s29, %s735_s30  }
  0x2b   : > { %p541_p9 = scmp.ge.s32.totalorder %s731_s15, 1  ;;  %p156_p1 = scmp.lt.s32.totalorder %s731_s15, 3 }
  0x2d   : > { %p157_p3 = pnand %p541_p9, %p156_p1 }
  0x2e   : > { %s858_s5 = sand.u32 (!%p157_p3), 1, %s723_s13   ;;  %p977_p6 = scmp.ne.s32.totalorder (!%p157_p3), %s973_s23, 0 }
  0x2f   : > { %160 = sbr.rel (%p157_p3) target bundleno = 798 (0x31e), region = 32  ;;  %s542_s9 = sshll.u32 (!%p157_p3), %s858_s5, 6 }
  0x30   : > { %s163_s10 = scalar_lea.sflag (!%p157_p3), [#allocation3], %s858_s5  ;;  %s166_s11 = scalar_lea.vmem (!%p157_p3), [#allocation2], %s542_s9 }
  0x34   : > { %710 = dma.done.wait (%p977_p6), %s163_s10, 1024  }
  0x35   : > { %712 = vsyncadd (%p977_p6), %s163_s10, 4294966272  ;;  %v868_v0 = vld [vmem:[%s166_s11] sm:$0xff]  ;;  %v870_v1 = vld [vmem:[%s166_s11 + $0x8] sm:$0xff]  ;;  %v736_v12 = vmov 0.0   ;;  %vm737_vm0 = vmmov 0   ;;  %v221_v17 = vlaneseq  ;;  %vm232_vm1 = vcmask 130112  }
  0x36   : > { %v872_v2 = vld [vmem:[%s166_s11 + $0x20] sm:$0xff]  ;;  %v197_v3 = vadd.f32 %v870_v1, %v868_v0  ;;  %v876_v4 = vld [vmem:[%s166_s11 + $0x28] sm:$0xff]  ;;  %v878_v5 = vld [vmem:[%s166_s11 + $0x10] sm:$0xff]  ;;  %563 = vmatprep.subr.mxu0 %v736_v12  ;;  %574 = vmatprep.subr.mxu1 %v736_v12  ;;  %vm239_vm2 = vcmask 195712   ;;  %vm246_vm3 = vcmask 261312   ;;  %vm248_vm4 = vcmask 261120  }
  0x37   : > { %v880_v6 = vld [vmem:[%s166_s11 + $0x18] sm:$0xff]  ;;  %v203_v7 = vadd.f32 %v876_v4, %v872_v2  ;;  %v884_v8 = vld [vmem:[%s166_s11 + $0x30] sm:$0xff]  ;;  %v214_v15 = vld [vmem:[%s967_s1 + $0x8] sm:$0xff]  ;;  %571 = vmatprep.mubr.msk.f32.mxu0 %vm737_vm0, %v736_v12  ;;  %576 = vmatprep.mubr.msk.f32.mxu1 %vm737_vm0, %v736_v12  ;;  %v222_v18 = vand.u32 127, %v221_v17  ;;  %v224_v19 = vshrl.u32 %v221_v17, 7  ;;  %vm333_vm5 = vcmask 1041408  }
  0x38   : > { %v886_v9 = vld [vmem:[%s166_s11 + $0x38] sm:$0xff]  ;;  %198 = vadd.xlane.f32.xlu0 %v197_v3  ;;  %v200_v10 = vadd.f32 %v880_v6, %v878_v5  ;;  %v215_v14 = vld [vmem:[%s967_s1 + $0x10] sm:$0xff]  ;;  %v213_v16 = vld [vmem:[%s967_s1] sm:$0xff]  ;;  %vm329_vm6 = vcmask 15360   ;;  %s188_s27 = scalar_lea.vmem [#allocation5], %s542_s9  ;;  %s555_s29 = sshll.u32 %s782_s16, 10 }
  0x39   : > { %204 = vadd.xlane.f32.xlu1 %v203_v7  ;;  %v206_v11 = vadd.f32 %v886_v9, %v884_v8  ;;  %v216_v13 = vld [vmem:[%s967_s1 + $0x18] sm:$0xff]  ;;  %v227_v20 = vadd.s32 4294967288, %v222_v18  ;;  %v234_v22 = vadd.s32 4294967280, %v222_v18  ;;  %v241_v23 = vadd.s32 4294967272, %v222_v18  ;;  %v328_v42 = vld [vmem:[%s968_s2] sm:$0x3]  ;;  %s921_s10 = scalar_lea.hbm %s969_s3, %s555_s29 }
  0x3a   : > { %564 = vmatpush3.msra.mxu0 %v216_v13  ;;  %v225_v25 = vsub.s32 %v222_v18, %v224_v19  ;;  %575 = vmatpush3.msk.msra.mxu1 %vm333_vm5, %v328_v42  ;;  %v415_v55 = vsub.s32 0, %v224_v19  ;;  %s462_s28 = sshll.u32 %s188_s27, 4  ;;  %s449_s16 = scalar_lea.sflag [#allocation4], %s858_s5  ;;  %s916_s28 = int_to_ptr.vmem [resolvable:$true] %s462_s28 }
  0x3b   : > { %565 = vmatprep.subr.mxu0 %v736_v12  ;;  %v230_v27 = vsub.s32 %v227_v20, %v224_v19  ;;  %v237_v28 = vsub.s32 %v234_v22, %v224_v19  ;;  %v244_v31 = vsub.s32 %v241_v23, %v224_v19  ;;  %s667_s11 = scalar_lea.vmem %s916_s28, 1024  ;;  %p978_p12 = scmp.ne.s32.totalorder %s974_s24, 0 }
  0x3c   : > { %201 = vadd.xlane.f32.xlu0 %v200_v10  ;;  %566 = vmatpush3.msra.mxu0 %v215_v14  ;;  %p668_p11 = scmp.ne.s32.totalorder %s916_s28, %s667_s11  ;;  %s738_s23 = smov [#allocation5]  }
  0x3d   : > { %207 = vadd.xlane.f32.xlu1 %v206_v11  ;;  %567 = vmatprep.subr.mxu0 %v736_v12  ;;  %s671_s4 = sshll.u32 %s738_s23, 4  ;;  %s672_s4 = int_to_ptr.vmem [resolvable:$false] %s671_s4 }
  0x3e   : > { %568 = vmatpush3.msra.mxu0 %v214_v15  ;;  %p669_p13 = pnand %p668_p11, %p978_p12  ;;  %s673_s6 = scalar_lea.vmem %s672_s4, 2048 }
  0x3f   : > { %569 = vmatprep.subr.mxu0 %v736_v12  ;;  %p674_p5 = scmp.lt.s32.totalorder %s916_s28, %s672_s4  ;;  %p675_p7 = scmp.lt.s32.totalorder %s673_s6, %s667_s11 }
  0x40   : > { %570 = vmatpush3.msra.mxu0 %v213_v16  ;;  %p670_p4 = pneg %p669_p13 }
  0x41   : > { %p676_p8 = por %p675_p7, %p674_p5 }
  0x43   : > { %p677_p10 = pnand %p676_p8, %p670_p4 }
  0xc1   : > { %v199_v21 = vpop.xlane.xlu0 %198 }
  0xc2   : > { %v205_v24 = vpop.xlane.xlu1 %204  ;;  %v209_v26 = vmul.f32 0.00390625, %v199_v21 }
  0xc3   : > { %v211_v29 = vmul.f32 0.00390625, %v205_v24 }
  0xc4   : > { %v226_v35 = vrot.slane %v209_v26, %v225_v25 }
  0xc5   : > { %v202_v30 = vpop.xlane.xlu0 %201  ;;  %v238_v37 = vrot.slane %v211_v29, %v237_v28 }
  0xc6   : > { %v210_v32 = vmul.f32 0.00390625, %v202_v30  ;;  %v208_v33 = vpop.xlane.xlu1 %207 }
  0xc7   : > { %v212_v34 = vmul.f32 0.00390625, %v208_v33 }
  0xc8   : > { %v231_v36 = vrot.slane %v210_v32, %v230_v27 }
  0xc9   : > { %v245_v38 = vrot.slane %v212_v34, %v244_v31 }
  0xca   : > { %v233_v39 = vsel %vm232_vm1, %v231_v36, %v226_v35 }
  0xcb   : > { %v240_v40 = vsel %vm239_vm2, %v238_v37, %v233_v39 }
  0xcc   : > { %v247_v41 = vsel %vm246_vm3, %v245_v38, %v240_v40 }
  0xcd   : > { %572 = vmatmul.mubr.msk.f32.vlgmr.msra.gmra.mxu0 %vm248_vm4, %v247_v41 }
 0x18d   : > { %v317_v43 = vpop.f32.mrf.mxu0 }
 0x18e   : > { %v545_v44 = vmul.f32 -1.442695, %v317_v43 }
 0x18f   : > { %v573_v45 = vpop.f32.mrf.mxu0 }
 0x190   : > { %631 = vpow2.f32 %v545_v44 }
 0x19d   : > { %v632_v46 = vpop.eup %631 }
 0x19e   : > { %v324_v47 = vadd.f32 1.0, %v632_v46 }
 0x1a0   : > { %633 = vrcp.f32 %v324_v47 }
 0x1ad   : > { %v634_v48 = vpop.eup %633 }
 0x1ae   : > { %v327_v49 = vmul.f32 %v634_v48, %v317_v43 }
 0x1b0   : > { %577 = vmatmul.mubr.msk.f32.vlgmr.msra.gmra.mxu1 %vm329_vm6, %v327_v49 }
 0x270   : > { %v403_v50 = vpop.f32.mrf.mxu1 }
 0x271   : > { %v548_v51 = vmul.f32 -1.442695, %v403_v50 }
 0x272   : > { %v578_v52 = vpop.f32.mrf.mxu1 }
 0x273   : > { %635 = vpow2.f32 %v548_v51 }
 0x280   : > { %v636_v53 = vpop.eup %635 }
 0x281   : > { %v410_v54 = vadd.f32 1.0, %v636_v53 }
 0x283   : > { %637 = vrcp.f32 %v410_v54 }
 0x290   : > { %v638_v56 = vpop.eup %637 }
 0x291   : > { %v416_v57 = vrot.slane %v638_v56, %v415_v55 }
 0x293   : > { %422 = vbcast.lane.b32.xlu1 %v416_v57, 264  ;;  %418 = vbcast.lane.b32.xlu0 %v416_v57, 256 }
 0x297   : > { %426 = vbcast.lane.b32.xlu1 %v416_v57, 272 }
 0x29b   : > { %430 = vbcast.lane.b32.xlu1 %v416_v57, 280 }
 0x305   : > { %v423_v58 = vpop.permute.xlu1 %422  ;;  %v419_v59 = vpop.permute.xlu0 %418 }
 0x306   : > { %v434_v60 = vmul.f32 %v423_v58, %v878_v5  ;;  %v435_v61 = vmul.f32 %v423_v58, %v880_v6  ;;  %v432_v62 = vmul.f32 %v419_v59, %v868_v0  ;;  %v433_v63 = vmul.f32 %v419_v59, %v870_v1 }
 0x308   : > { %442 = vst [vmem:[%s188_s27 + $0x10] sm:$0xff] %v434_v60  ;;  %443 = vst [vmem:[%s188_s27 + $0x18] sm:$0xff] %v435_v61 }
 0x309   : > { %440 = vst [vmem:[%s188_s27] sm:$0xff] %v432_v62  ;;  %441 = vst [vmem:[%s188_s27 + $0x8] sm:$0xff] %v433_v63  ;;  %v427_v3 = vpop.permute.xlu1 %426 }
 0x30a   : > { %v436_v7 = vmul.f32 %v427_v3, %v872_v2  ;;  %v437_v5 = vmul.f32 %v427_v3, %v876_v4 }
 0x30c   : > { %444 = vst [vmem:[%s188_s27 + $0x20] sm:$0xff] %v436_v7  ;;  %445 = vst [vmem:[%s188_s27 + $0x28] sm:$0xff] %v437_v5 }
 0x30d   : > { %v431_v0 = vpop.permute.xlu1 %430 }
 0x30e   : > { %v438_v1 = vmul.f32 %v431_v0, %v884_v8  ;;  %v439_v2 = vmul.f32 %v431_v0, %v886_v9 }
 0x310   : > { %446 = vst [vmem:[%s188_s27 + $0x30] sm:$0xff] %v438_v1  ;;  %447 = vst [vmem:[%s188_s27 + $0x38] sm:$0xff] %v439_v2 }
 0x311   : > { %680 = shalt.err (!%p677_p10)
}
 0x312   : > { %s681_s7 = scalar_lea.hbm %s921_s10, 1024  ;;  %s685_s19 = scalar_lea.hbm %s969_s3, 2048 }
 0x313   : > { %p682_p0 = scmp.ne.s32.totalorder %s921_s10, %s681_s7  ;;  %p686_p1 = scmp.lt.s32.totalorder %s921_s10, %s969_s3 }
 0x314   : > { %p687_p3 = scmp.lt.s32.totalorder %s685_s19, %s681_s7 }
 0x315   : > { %p683_p2 = pnand %p682_p0, %p978_p12 }
 0x316   : > { %p688_p6 = por %p687_p3, %p686_p1 }
 0x317   : > { %p684_p9 = pneg %p683_p2 }
 0x319   : > { %p689_p11 = pnand %p688_p6, %p684_p9 }
 0x31b   : > { %692 = shalt.err (!%p689_p11)
}
 0x31c   : > { %s739_s26 = smov 256   ;;  %s740_s27 = smov 16  }
 0x31d   : > { %581 = dma.vmem_to_hbm [thread:$0]  (%p978_p12), %s916_s28, 1024, %s921_s10, %s449_s16, %s739_s26, %s739_s26, %s740_s27  }
 0x31e PF: > { %s477_s29 = sand.u32 1, %s719_s12   ;;  %p979_p13 = scmp.ne.s32.totalorder %s975_s25, 0 }
 0x31f   : > { %p980_p4 = scmp.ge.s32.totalorder %s731_s15, 2  ;;  %s478_s30 = scalar_lea.sflag [#allocation4], %s477_s29 }
 0x321   : > { %p588_p5 = pnand %p980_p4, %p979_p13 }
 0x323   : > { %p589_p7 = pneg %p588_p5 }
 0x325   : > { %714 = dma.done.wait (%p589_p7), %s478_s30, 1024  }
 0x326   : > { %716 = vsyncadd (%p589_p7), %s478_s30, 4294966272  ;;  %p16_p8 = scmp.ge.s32.totalorder %s786_s18, 4   ;;  %s981_s12 = smov %s723_s13 }
 0x327   : > { %s982_s13 = smov %s727_s14  ;;  %s983_s14 = smov %s798_s21 }
 0x328   : > { %s984_s15 = smov %s786_s18  ;;  %18 = sbr.rel (!%p16_p8) target bundleno = 5 (0x5), region = 77 }
 0x32d   :  { %483 = vsyncpa [#allocation3], 1 }
 0x32e   :  { %485 = vsyncpa [#allocation3 + $0x1], 1 }
 0x32f   :  { %486 = vsyncpa [#allocation4], 1 }
 0x330   :  { %488 = vsyncpa [#allocation4 + $0x1], 1 }

</bundles_post_ra>
